<compile_context>
chip_gen: v7x
topology: tpu7x:2x2x1
jax: 0.10.0
libtpu: 0.0.40
codegen_flags: <defaults>
</compile_context>

<pallas_src>
import functools

import jax
import jax.numpy as jnp
from jax import lax
from jax.experimental import pallas as pl
from jax.experimental.pallas import tpu as pltpu

EPS = 1e-5       # PyTorch InstanceNorm2d default eps
MOD_FACT = 4


# ---------------------------------------------------------------------------
# Fused kernel: conv-as-matmul + InstanceNorm2d(affine) + PReLU
#   patches : (K_pad, B*P)   batch folded into lanes (batch-major columns)
#   weight  : (C_out, K_pad)
#   affine  : (3, C_out, 1)  rows = gamma, beta, alpha
#   out     : (C_out, B*P)
# ---------------------------------------------------------------------------
def _encoder_kernel(p_ref, w_ref, aff_ref, o_ref, *, batch, spatial):
    w = w_ref[...]                                   # (C_out, K_pad)
    patches = p_ref[...]                             # (K_pad, B*P)
    # Convolution as one wide MXU matmul.
    acc = jnp.dot(w, patches, preferred_element_type=jnp.float32)  # (C_out, B*P)

    gamma = aff_ref[0]                               # (C_out, 1)
    beta = aff_ref[1]
    alpha = aff_ref[2]
    inv_p = jnp.float32(1.0 / spatial)

    # Static unroll over batch: instance-norm stats must cover the full
    # spatial extent per (batch, channel); each batch occupies a contiguous
    # lane block of width `spatial`.
    for b in range(batch):
        ab = acc[:, b * spatial:(b + 1) * spatial]   # (C_out, P) static slice
        s1 = jnp.sum(ab, axis=1, keepdims=True)
        s2 = jnp.sum(ab * ab, axis=1, keepdims=True)
        mean = s1 * inv_p
        var = s2 * inv_p - mean * mean               # biased variance
        xhat = (ab - mean) * lax.rsqrt(var + EPS)
        y = xhat * gamma + beta
        o_ref[:, b * spatial:(b + 1) * spatial] = jnp.where(y >= 0.0, y, alpha * y)


# ---------------------------------------------------------------------------
# Forward: ChannelEncoder_SF9
#   Conv2d(in_channel, channels, kernel_size=(1,3), stride=(1,2))
#   InstanceNorm2d(channels, affine=True) ; PReLU(channels)
#   then view -> permute(0,1,3,2,4) -> view with mod_fact=4
# ---------------------------------------------------------------------------
def channel_encoder_sf9(x, params):
    w, b, gamma, beta, alpha = params                # b unused: cancels in InstanceNorm
    del b
    B, C_in, H, W = x.shape
    C_out = w.shape[0]
    Ho = H                                           # kernel/stride 1 on freq axis
    Wo = (W - 3) // 2 + 1                            # kernel 3, stride 2 on time axis
    P = Ho * Wo
    K = C_in * 3
    K_pad = ((K + 7) // 8) * 8

    # --- im2col glue (pure layout, no FLOPs): patches[b, c*3+j, f*Wo+t] = x[b,c,f,2t+j]
    cols = [
        lax.slice(x, (0, 0, 0, j), (B, C_in, H, j + 2 * (Wo - 1) + 1), (1, 1, 1, 2))
        for j in range(3)
    ]                                                # each (B, C_in, Ho, Wo)
    patches = jnp.stack(cols, axis=2).reshape(B, K, P)        # OIHW flatten order
    patches = patches.transpose(1, 0, 2).reshape(K, B * P)    # batch folded into lanes
    patches = jnp.pad(patches, ((0, K_pad - K), (0, 0))).astype(jnp.float32)

    w2 = jnp.pad(w.reshape(C_out, K), ((0, 0), (0, K_pad - K))).astype(jnp.float32)
    affine = jnp.stack([gamma, beta, alpha], axis=0).reshape(3, C_out, 1)
    affine = affine.astype(jnp.float32)

    kernel = functools.partial(_encoder_kernel, batch=B, spatial=P)
    y2d = pl.pallas_call(
        kernel,
        out_shape=jax.ShapeDtypeStruct((C_out, B * P), jnp.float32),
        in_specs=[
            pl.BlockSpec(memory_space=pltpu.MemorySpace.VMEM),
            pl.BlockSpec(memory_space=pltpu.MemorySpace.VMEM),
            pl.BlockSpec(memory_space=pltpu.MemorySpace.VMEM),
        ],
        out_specs=pl.BlockSpec(memory_space=pltpu.MemorySpace.VMEM),
    )(patches, w2, affine)                           # (C_out, B*P), lane-dense store

    # --- final mod_fact view/permute/view (layout-only glue)
    Te = Wo // MOD_FACT
    y = y2d.reshape(C_out, B, Ho, Te, MOD_FACT)      # y2d[c, b*P + f*Wo + te*4 + m]
    out = y.transpose(1, 0, 3, 2, 4).reshape(B, C_out * Te, Ho * MOD_FACT)
    return out


# ---------------------------------------------------------------------------
# Deterministic parameter init (shapes from the module's __init__)
# ---------------------------------------------------------------------------
def init_params(key, in_channel, channels):
    k1, k2, k3, k4, k5 = jax.random.split(key, 5)
    fan = in_channel * 1 * 3
    w = jax.random.normal(k1, (channels, in_channel, 1, 3), jnp.float32) / jnp.sqrt(fan)
    b = 0.1 * jax.random.normal(k2, (channels,), jnp.float32)
    gamma = 1.0 + 0.1 * jax.random.normal(k3, (channels,), jnp.float32)
    beta = 0.1 * jax.random.normal(k4, (channels,), jnp.float32)
    alpha = 0.25 + 0.05 * jax.random.normal(k5, (channels,), jnp.float32)
    return (w, b, gamma, beta, alpha)


# ---------------------------------------------------------------------------
# Pure-JAX reference (includes the conv bias, proving it cancels)
# ---------------------------------------------------------------------------
def ref_forward(x, params):
    w, b, gamma, beta, alpha = params
    y = lax.conv_general_dilated(
        x, w, window_strides=(1, 2), padding=[(0, 0), (0, 0)],
        dimension_numbers=("NCHW", "OIHW", "NCHW"),
    )
    y = y + b[None, :, None, None]
    mean = jnp.mean(y, axis=(2, 3), keepdims=True)
    var = jnp.mean((y - mean) ** 2, axis=(2, 3), keepdims=True)
    y = (y - mean) * lax.rsqrt(var + EPS)
    y = y * gamma[None, :, None, None] + beta[None, :, None, None]
    y = jnp.where(y >= 0, y, alpha[None, :, None, None] * y)
    B, C, F, T = y.shape
    Te = T // MOD_FACT
    y = y.reshape(B, C, F, Te, MOD_FACT).transpose(0, 1, 3, 2, 4)
    return y.reshape(B, C * Te, F * MOD_FACT)


if __name__ == "__main__":
    key = jax.random.PRNGKey(0)
    kx, kp = jax.random.split(key)

    # Small shapes consistent with the module (NCHW).  W=17 -> subsampled time
    # Wo=8, divisible by mod_fact=4; spatial P = 16*8 = 128 so B*P = 256 lanes.
    B, Cin, H, W = 2, 2, 16, 17
    channels = 8
    x = jax.random.normal(kx, (B, Cin, H, W), jnp.float32)
    params = init_params(kp, Cin, channels)

    out = channel_encoder_sf9(x, params)
    out = jax.block_until_ready(out)

    ref = ref_forward(x, params)
    assert out.shape == ref.shape, (out.shape, ref.shape)
    if not jnp.allclose(out, ref, rtol=1e-3, atol=1e-3):
        raise AssertionError("Pallas output mismatch vs pure-JAX reference")
    print("KERNEL_OK")
</pallas_src>

<mosaic_0001>
module attributes {stable_mosaic.version = 11 : i64} {
  func.func @_encoder_kernel(%arg0: memref<8x256xf32, #tpu.memory_space<vmem>>, %arg1: memref<8x8xf32, #tpu.memory_space<vmem>>, %arg2: memref<3x8x1xf32, #tpu.memory_space<vmem>>, %arg3: memref<8x256xf32, #tpu.memory_space<vmem>>) attributes {dimension_semantics = [], scalar_prefetch = 0 : i64, scratch_operands = 0 : i64, tpu.core_type = #tpu.core_type<tc>} {
    %c0 = arith.constant 0 : index
    %c0_0 = arith.constant 0 : index
    %0 = vector.load %arg1[%c0, %c0_0] : memref<8x8xf32, #tpu.memory_space<vmem>>, vector<8x8xf32>
    %c0_1 = arith.constant 0 : index
    %c0_2 = arith.constant 0 : index
    %1 = vector.load %arg0[%c0_1, %c0_2] : memref<8x256xf32, #tpu.memory_space<vmem>>, vector<8x256xf32>
    %cst = arith.constant dense<0.000000e+00> : vector<8x256xf32>
    %2 = tpu.matmul %0, %1, %cst {dimension_numbers = #tpu.dot_dimension_numbers<[1], [0], [0], [1], [0, 0, 1, 1], [], []>} : vector<8x8xf32>, vector<8x256xf32>, vector<8x256xf32> -> vector<8x256xf32>
    %c0_3 = arith.constant 0 : index
    %c0_4 = arith.constant 0 : index
    %c0_5 = arith.constant 0 : index
    %3 = vector.load %arg2[%c0_3, %c0_4, %c0_5] : memref<3x8x1xf32, #tpu.memory_space<vmem>>, vector<1x8x1xf32>
    %4 = vector.shape_cast %3 : vector<1x8x1xf32> to vector<8x1xf32>
    %c1 = arith.constant 1 : index
    %c0_6 = arith.constant 0 : index
    %c0_7 = arith.constant 0 : index
    %5 = vector.load %arg2[%c1, %c0_6, %c0_7] : memref<3x8x1xf32, #tpu.memory_space<vmem>>, vector<1x8x1xf32>
    %6 = vector.shape_cast %5 : vector<1x8x1xf32> to vector<8x1xf32>
    %c2 = arith.constant 2 : index
    %c0_8 = arith.constant 0 : index
    %c0_9 = arith.constant 0 : index
    %7 = vector.load %arg2[%c2, %c0_8, %c0_9] : memref<3x8x1xf32, #tpu.memory_space<vmem>>, vector<1x8x1xf32>
    %8 = vector.shape_cast %7 : vector<1x8x1xf32> to vector<8x1xf32>
    %9 = vector.extract_strided_slice %2 {offsets = [0, 0], sizes = [8, 128], strides = [1, 1]} : vector<8x256xf32> to vector<8x128xf32>
    %cst_10 = arith.constant dense<0.000000e+00> : vector<8xf32>
    %10 = vector.multi_reduction <add>, %9, %cst_10 [1] : vector<8x128xf32> to vector<8xf32>
    %11 = vector.shape_cast %10 : vector<8xf32> to vector<8x1xf32>
    %12 = arith.mulf %9, %9 : vector<8x128xf32>
    %cst_11 = arith.constant dense<0.000000e+00> : vector<8xf32>
    %13 = vector.multi_reduction <add>, %12, %cst_11 [1] : vector<8x128xf32> to vector<8xf32>
    %14 = vector.shape_cast %13 : vector<8xf32> to vector<8x1xf32>
    %cst_12 = arith.constant 7.812500e-03 : f32
    %15 = vector.broadcast %cst_12 : f32 to vector<8x1xf32>
    %16 = arith.mulf %11, %15 : vector<8x1xf32>
    %cst_13 = arith.constant 7.812500e-03 : f32
    %17 = vector.broadcast %cst_13 : f32 to vector<8x1xf32>
    %18 = arith.mulf %14, %17 : vector<8x1xf32>
    %19 = arith.mulf %16, %16 : vector<8x1xf32>
    %20 = arith.subf %18, %19 : vector<8x1xf32>
    %21 = vector.broadcast %16 : vector<8x1xf32> to vector<8x128xf32>
    %22 = arith.subf %9, %21 : vector<8x128xf32>
    %cst_14 = arith.constant 9.99999974E-6 : f32
    %23 = vector.broadcast %cst_14 : f32 to vector<8x1xf32>
    %24 = arith.addf %20, %23 : vector<8x1xf32>
    %25 = math.rsqrt %24 : vector<8x1xf32>
    %26 = vector.broadcast %25 : vector<8x1xf32> to vector<8x128xf32>
    %27 = arith.mulf %22, %26 : vector<8x128xf32>
    %28 = vector.broadcast %4 : vector<8x1xf32> to vector<8x128xf32>
    %29 = arith.mulf %27, %28 : vector<8x128xf32>
    %30 = vector.broadcast %6 : vector<8x1xf32> to vector<8x128xf32>
    %31 = arith.addf %29, %30 : vector<8x128xf32>
    %cst_15 = arith.constant 0.000000e+00 : f32
    %32 = vector.broadcast %cst_15 : f32 to vector<8x128xf32>
    %33 = arith.cmpf oge, %31, %32 : vector<8x128xf32>
    %34 = vector.broadcast %8 : vector<8x1xf32> to vector<8x128xf32>
    %35 = arith.mulf %34, %31 : vector<8x128xf32>
    %36 = arith.select %33, %31, %35 : vector<8x128xi1>, vector<8x128xf32>
    %c0_16 = arith.constant 0 : index
    %c0_17 = arith.constant 0 : index
    %37 = vector.load %arg3[%c0_16, %c0_17] : memref<8x256xf32, #tpu.memory_space<vmem>>, vector<8x128xf32>
    tpu.vector_store %arg3[%c0_16, %c0_17], %36 {strides = array<i32>} : memref<8x256xf32, #tpu.memory_space<vmem>>, vector<8x128xf32>,
    %38 = vector.extract_strided_slice %2 {offsets = [0, 128], sizes = [8, 128], strides = [1, 1]} : vector<8x256xf32> to vector<8x128xf32>
    %cst_18 = arith.constant dense<0.000000e+00> : vector<8xf32>
    %39 = vector.multi_reduction <add>, %38, %cst_18 [1] : vector<8x128xf32> to vector<8xf32>
    %40 = vector.shape_cast %39 : vector<8xf32> to vector<8x1xf32>
    %41 = arith.mulf %38, %38 : vector<8x128xf32>
    %cst_19 = arith.constant dense<0.000000e+00> : vector<8xf32>
    %42 = vector.multi_reduction <add>, %41, %cst_19 [1] : vector<8x128xf32> to vector<8xf32>
    %43 = vector.shape_cast %42 : vector<8xf32> to vector<8x1xf32>
    %cst_20 = arith.constant 7.812500e-03 : f32
    %44 = vector.broadcast %cst_20 : f32 to vector<8x1xf32>
    %45 = arith.mulf %40, %44 : vector<8x1xf32>
    %cst_21 = arith.constant 7.812500e-03 : f32
    %46 = vector.broadcast %cst_21 : f32 to vector<8x1xf32>
    %47 = arith.mulf %43, %46 : vector<8x1xf32>
    %48 = arith.mulf %45, %45 : vector<8x1xf32>
    %49 = arith.subf %47, %48 : vector<8x1xf32>
    %50 = vector.broadcast %45 : vector<8x1xf32> to vector<8x128xf32>
    %51 = arith.subf %38, %50 : vector<8x128xf32>
    %cst_22 = arith.constant 9.99999974E-6 : f32
    %52 = vector.broadcast %cst_22 : f32 to vector<8x1xf32>
    %53 = arith.addf %49, %52 : vector<8x1xf32>
    %54 = math.rsqrt %53 : vector<8x1xf32>
    %55 = vector.broadcast %54 : vector<8x1xf32> to vector<8x128xf32>
    %56 = arith.mulf %51, %55 : vector<8x128xf32>
    %57 = vector.broadcast %4 : vector<8x1xf32> to vector<8x128xf32>
    %58 = arith.mulf %56, %57 : vector<8x128xf32>
    %59 = vector.broadcast %6 : vector<8x1xf32> to vector<8x128xf32>
    %60 = arith.addf %58, %59 : vector<8x128xf32>
    %cst_23 = arith.constant 0.000000e+00 : f32
    %61 = vector.broadcast %cst_23 : f32 to vector<8x128xf32>
    %62 = arith.cmpf oge, %60, %61 : vector<8x128xf32>
    %63 = vector.broadcast %8 : vector<8x1xf32> to vector<8x128xf32>
    %64 = arith.mulf %63, %60 : vector<8x128xf32>
    %65 = arith.select %62, %60, %64 : vector<8x128xi1>, vector<8x128xf32>
    %c0_24 = arith.constant 0 : index
    %c128 = arith.constant 128 : index
    %66 = vector.load %arg3[%c0_24, %c128] : memref<8x256xf32, #tpu.memory_space<vmem>>, vector<8x128xf32>
    tpu.vector_store %arg3[%c0_24, %c128], %65 {strides = array<i32>} : memref<8x256xf32, #tpu.memory_space<vmem>>, vector<8x128xf32>,
    return
  }
}

</mosaic_0001>

<bundles_post_ra>
// kernel: tpu_custom_call.1
= control target key start
LH: loop header
LB: loop body
LE: loop exit
PB: predicated region body
PF: predicated region fallthrough
CT: control target
= control target key end

     0   :  { %vm18_vm0 = vcmask 64512   ;;  %v201_v3 = vmov 0.0   ;;  %s254_s0 = inlined_call_operand.vmem [shape: f32[8,256], index: 0, kind: input, shape index: {}]   ;;  %s255_s1 = inlined_call_operand.vmem [shape: f32[8,8], index: 1, kind: input, shape index: {}]   ;;  %s256_s2 = inlined_call_operand.vmem [shape: f32[3,8,1], index: 2, kind: input, shape index: {}]   ;;  %s257_s3 = inlined_call_operand.hbm [shape: f32[8,256], index: 3, kind: output, shape index: {}]  }
   0x1   :  { %v17_v0 = vld [vmem:[%s254_s0 + $0x8] sm:$0xff]  ;;  %v16_v1 = vld [vmem:[%s254_s0] sm:$0xff]  ;;  %86 = vmatprep.mubr.f32.mxu0 %v201_v3 }
   0x2   :  { %v15_v2 = vld [vmem:[%s255_s1] sm:$0xff]  ;;  %22 = vmatprep.subr.mxu0 %v17_v0  ;;  %v166_v4 = vld [vmem:[%s256_s2 + $0x8] sm:$0xff] }
   0x3   :  { %8 = vsyncpa [#allocation3], 0  ;;  %23 = vmatpush1.msra.mxu0 %v16_v1  ;;  %v202_v5 = vmov 0   ;;  %v167_v10 = vld [vmem:[%s256_s2 + $0x10] sm:$0xff]  ;;  %v93_v11 = vld [vmem:[%s256_s2] sm:$0xff]  ;;  %s203_s2 = smov [#allocation2]  }
   0x4   :  { %172 = vset.pattern.permute.xlu1 %v202_v5  ;;  %165 = vmatmul.mubr.msk.f32.vlgmr.msra.gmra.mrb[0].mxu0 %vm18_vm0, %v15_v2  ;;  %s157_s22 = sshll.u32 %s203_s2, 4  ;;  %s158_s22 = int_to_ptr.vmem [resolvable:$true] %s157_s22 }
   0x5   :  { %119 = vperm.xlu1 %172, %v166_v4   ;;  %171 = vset.pattern.permute.xlu0 %v202_v5  ;;  %s177_s23 = scalar_lea.vmem %s158_s22, 256  ;;  %p182_p1 = scmp.lt.s32.totalorder %s158_s22, %s158_s22 }
   0x6   :  { %p178_p0 = scmp.ne.s32.totalorder %s158_s22, %s177_s23  ;;  %p183_p2 = scmp.lt.s32.totalorder %s177_s23, %s177_s23 }
   0x8   :  { %p184_p3 = por %p183_p2, %p182_p1 }
   0xa   :  { %p185_p4 = pnand %p184_p3, %p178_p0 }
  0x84   :  { %v120_v12 = vpop.permute.xlu1 %119 }
  0xd7   :  { %v88_v6 = vpop.f32.mrb[0].mxu0 }
  0xd8   :  { %98 = vadd.xlane.f32.xlu0 %v88_v6  ;;  %v90_v7 = vpop.f32.mrb[1].mxu0  ;;  %v100_v8 = vmul.f32 %v88_v6, %v88_v6 }
  0xd9   :  { %v134_v9 = vmul.f32 %v90_v7, %v90_v7 }
  0xda   :  { %101 = vadd.xlane.f32.xlu1 %v100_v8 }
  0xdc   :  { %132 = vadd.xlane.f32.xlu0 %v90_v7 }
  0xde   :  { %135 = vadd.xlane.f32.xlu1 %v134_v9 }
  0xef   :  { %126 = vperm.xlu1 %172, %v167_v10  }
  0xf2   :  { %113 = vperm.xlu0 %171, %v93_v11  }
 0x165   :  { %v99_v13 = vpop.xlane.xlu0 %98 }
 0x166   :  { %v103_v14 = vmul.f32 0.0078125, %v99_v13 }
 0x167   :  { %v102_v15 = vpop.xlane.xlu1 %101 }
 0x168   :  { %v105_v16 = vmul.f32 %v103_v14, %v103_v14  ;;  %v104_v17 = vmul.f32 0.0078125, %v102_v15  ;;  %v107_v27 = vsub.f32 %v88_v6, %v103_v14 }
 0x169   :  { %v133_v18 = vpop.xlane.xlu0 %132 }
 0x16a   :  { %v106_v19 = vsub.f32 %v104_v17, %v105_v16  ;;  %v137_v20 = vmul.f32 0.0078125, %v133_v18 }
 0x16b   :  { %v136_v21 = vpop.xlane.xlu1 %135 }
 0x16c   :  { %v108_v22 = vadd.f32 1e-05, %v106_v19  ;;  %v139_v23 = vmul.f32 %v137_v20, %v137_v20  ;;  %v138_v24 = vmul.f32 0.0078125, %v136_v21  ;;  %v141_v31 = vsub.f32 %v90_v7, %v137_v20 }
 0x16e   :  { %173 = vrsqrt.f32 %v108_v22  ;;  %v140_v25 = vsub.f32 %v138_v24, %v139_v23 }
 0x16f   :  { %v127_v36 = vpop.permute.xlu1 %126 }
 0x170   :  { %v142_v26 = vadd.f32 1e-05, %v140_v25 }
 0x171   :  { %v114_v29 = vpop.permute.xlu0 %113 }
 0x172   :  { %175 = vrsqrt.f32 %v142_v26 }
 0x178   :  { %v174_v28 = vpop.eup %173 }
 0x179   :  { %v110_v30 = vmul.f32 %v174_v28, %v107_v27 }
 0x17b   :  { %v116_v32 = vmul.f32 %v114_v29, %v110_v30 }
 0x17c   :  { %v176_v33 = vpop.eup %175 }
 0x17d   :  { %v122_v34 = vadd.f32 %v120_v12, %v116_v32  ;;  %v144_v35 = vmul.f32 %v176_v33, %v141_v31 }
 0x17f   :  { %v129_v37 = vmul.f32 %v127_v36, %v122_v34  ;;  %v145_v38 = vmul.f32 %v144_v35, %v114_v29  ;;  %vm123_vm1 = vcmp.ge.f32.partialorder %v122_v34, 0.0 }
 0x181   :  { %v146_v39 = vadd.f32 %v145_v38, %v120_v12  ;;  %v130_v40 = vsel %vm123_vm1, %v122_v34, %v129_v37 }
 0x182   :  { %131 = vst [vmem:[#allocation2] sm:$0xff] %v130_v40 }
 0x183   :  { %v148_v41 = vmul.f32 %v146_v39, %v127_v36  ;;  %vm147_vm2 = vcmp.ge.f32.partialorder %v146_v39, 0.0 }
 0x185   :  { %v149_v42 = vsel %vm147_vm2, %v146_v39, %v148_v41 }
 0x186   :  { %150 = vst [vmem:[#allocation2 + $0x8] sm:$0xff] %v149_v42 }
 0x187   :  { %188 = shalt.err (!%p185_p4)
}
 0x188   :  { %s189_s26 = scalar_lea.hbm %s257_s3, 256 }
 0x189   :  { %p190_p5 = scmp.ne.s32.totalorder %s257_s3, %s189_s26  ;;  %p193_p6 = scmp.lt.u32.totalorder %s189_s26, %s257_s3 }
 0x18b   :  { %p195_p7 = pnand %p193_p6, %p190_p5 }
 0x18d   :  { %198 = shalt.err (!%p195_p7)
}
 0x18e   :  { %160 = dma.vmem_to_hbm [thread:$0]  %s158_s22, 256, %s257_s3, [#allocation3]  }
 0x18f   :  { %199 = dma.done.wait [#allocation3], 256  }
 0x190   :  { %200 = vsyncadd [#allocation3], 4294967040 }
 0x191   :  { %164 = vsyncpa [#allocation3], 1 }

</bundles_post_ra>
